<compile_context>
chip_gen: v7x
topology: tpu7x:2x2x1
jax: 0.10.0
libtpu: 0.0.40
codegen_flags: <defaults>
</compile_context>

<pallas_src>
import math

import jax
import jax.numpy as jnp
from jax.experimental import pallas as pl
from jax.experimental.pallas import tpu as pltpu

LANE = 128


def _round_up(x, m):
    return ((x + m - 1) // m) * m


def _pad2d(x, rows, cols):
    r, c = x.shape
    return jnp.pad(x, ((0, rows - r), (0, cols - c)))


def _policy_kernel(state_ref, w1_ref, b1_ref, w2_ref, b2_ref, w3_ref, b3_ref,
                   out_ref):
    # Matmuls run in the weights' dtype (bf16 or f32) with f32 accumulation;
    # the elementwise epilogue (bias add, relu, tanh) stays in f32.
    wdt = w1_ref.dtype
    x = state_ref[...].astype(wdt)
    h = jnp.dot(x, w1_ref[...], preferred_element_type=jnp.float32)
    h = jnp.maximum(h + b1_ref[...], 0.0)               # (TB,H) + (1,H) bcast
    h = jnp.dot(h.astype(wdt), w2_ref[...], preferred_element_type=jnp.float32)
    h = jnp.maximum(h + b2_ref[...], 0.0)
    m = jnp.dot(h.astype(wdt), w3_ref[...], preferred_element_type=jnp.float32)
    out_ref[...] = jnp.tanh(m + b3_ref[...])            # tanh -> EUP slot


def make_policy_forward(params, *, use_bf16=None, tb=None):
    """Build a jitted forward(state) closure with padded params cached.

    params: dict of (in, out) weights w1/w2/w3 and (1, out) biases b1/b2/b3.
    use_bf16: None -> auto (bf16 weights when hidden_dim >= 256).
    tb: optional batch-tile override (multiple of 8, or 16 on the bf16 path).
    """
    num_inputs, hidden_dim = params["w1"].shape
    num_actions = params["w3"].shape[1]

    if use_bf16 is None:
        use_bf16 = hidden_dim >= 256
    wdt = jnp.bfloat16 if use_bf16 else jnp.float32
    sub = 16 if use_bf16 else 8                        # sublane packing

    in_p = _round_up(num_inputs, LANE)
    h_p = _round_up(hidden_dim, LANE)
    a_p = _round_up(num_actions, LANE)

    # Pad + cast ONCE (cached, device-resident across forward calls).
    f32 = jnp.float32
    w1 = _pad2d(params["w1"].astype(f32), in_p, h_p).astype(wdt)
    b1 = _pad2d(params["b1"].astype(f32), 1, h_p)
    w2 = _pad2d(params["w2"].astype(f32), h_p, h_p).astype(wdt)
    b2 = _pad2d(params["b2"].astype(f32), 1, h_p)
    w3 = _pad2d(params["w3"].astype(f32), h_p, a_p).astype(wdt)
    b3 = _pad2d(params["b3"].astype(f32), 1, a_p)

    # Generation-aware VMEM ceiling (leave 1/8 headroom below physical).
    try:
        vmem_phys = pltpu.get_tpu_info().vmem_capacity_bytes
    except Exception:
        vmem_phys = 64 << 20                           # conservative (v7x)
    vmem_cap = int(vmem_phys * 7 // 8)

    wbytes = 2 if use_bf16 else 4
    weight_bytes = (in_p * h_p + h_p * h_p + h_p * a_p) * wbytes
    bias_bytes = (2 * h_p + a_p) * 4

    def _choose_tb(B):
        if tb is not None:
            assert tb % sub == 0, f"tb must be a multiple of {sub}"
            return tb
        if B <= 512:
            return _round_up(B, sub)
        # Prefer 512 (~85% of HBM roofline per tile sweep) but shrink if a
        # smaller tile meaningfully reduces padded-tail waste.
        best, best_waste = 512, _round_up(B, 512) - B
        for cand in (512, 448, 384, 320, 256):
            waste = _round_up(B, cand) - B
            if waste < best_waste:
                best, best_waste = cand, waste
        return best

    def _resident(shape):
        # Constant index_map -> block never changes -> single buffer suffices.
        return pl.BlockSpec(shape, lambda i: (0, 0),
                            pipeline_mode=pl.Buffered(1))

    @jax.jit
    def forward(state):
        B = state.shape[0]
        tbv = _choose_tb(B)
        b_p = _round_up(B, tbv)
        state_p = _pad2d(state.astype(jnp.float32), b_p, in_p)

        # Double-buffered state/out tiles + single-buffered resident weights
        # + activation headroom; clamp to the generation-aware ceiling.
        est_vmem = (
            2 * tbv * in_p * 4 + 2 * tbv * a_p * 4
            + weight_bytes + bias_bytes
            + 3 * tbv * h_p * 4
        )
        vmem_limit = int(min(max(est_vmem * 3 // 2, 32 << 20), vmem_cap))
        cparams = pltpu.CompilerParams(
            dimension_semantics=("parallel",),          # megacore batch split
            vmem_limit_bytes=vmem_limit,
        )

        out_padded = pl.pallas_call(
            _policy_kernel,
            out_shape=jax.ShapeDtypeStruct((b_p, a_p), jnp.float32),
            grid=(b_p // tbv,),
            in_specs=[
                # State/out are the only streaming DMAs (depth-2 default is
                # enough here; bump via pl.Buffered(3) only if a trace shows
                # exposed DMA at tiny hidden_dim).
                pl.BlockSpec((tbv, in_p), lambda i: (i, 0)),
                _resident((in_p, h_p)),
                _resident((1, h_p)),
                _resident((h_p, h_p)),
                _resident((1, h_p)),
                _resident((h_p, a_p)),
                _resident((1, a_p)),
            ],
            out_specs=pl.BlockSpec((tbv, a_p), lambda i: (i, 0)),
            compiler_params=cparams,
        )(state_p, w1, b1, w2, b2, w3, b3)

        return out_padded[:B, :num_actions]

    return forward


def xavier_uniform(key, fan_in, fan_out, gain=1.0):
    # matches torch.nn.init.xavier_uniform_ bound; stored as (in, out)
    bound = gain * math.sqrt(6.0 / (fan_in + fan_out))
    return jax.random.uniform(key, (fan_in, fan_out), jnp.float32,
                              minval=-bound, maxval=bound)


def init_params(key, num_inputs, num_actions, hidden_dim):
    k1, k2, k3 = jax.random.split(key, 3)
    return {
        "w1": xavier_uniform(k1, num_inputs, hidden_dim),
        "b1": jnp.zeros((1, hidden_dim), jnp.float32),
        "w2": xavier_uniform(k2, hidden_dim, hidden_dim),
        "b2": jnp.zeros((1, hidden_dim), jnp.float32),
        "w3": xavier_uniform(k3, hidden_dim, num_actions),
        "b3": jnp.zeros((1, num_actions), jnp.float32),
    }


def reference_forward(state, params):
    x = jnp.maximum(state @ params["w1"] + params["b1"], 0.0)
    x = jnp.maximum(x @ params["w2"] + params["b2"], 0.0)
    return jnp.tanh(x @ params["w3"] + params["b3"])


if __name__ == "__main__":
    key = jax.random.PRNGKey(0)
    k_state, k_params, k_state2 = jax.random.split(key, 3)

    # Small shapes consistent with the module.
    batch, num_inputs, num_actions, hidden_dim = 2, 16, 8, 32
    params = init_params(k_params, num_inputs, num_actions, hidden_dim)

    # 1) Exact f32 path (hidden_dim < 256 -> f32 weights by default).
    forward = make_policy_forward(params)
    state = jax.random.normal(k_state, (batch, num_inputs), jnp.float32)
    mean = jax.block_until_ready(forward(state))
    ref = reference_forward(state, params)
    assert mean.shape == (batch, num_actions)
    assert jnp.allclose(mean, ref, atol=1e-5, rtol=1e-5), "mismatch vs reference"

    # 2) Multi-block batch grid with a ragged (zero-padded) tail.
    batch2 = 200
    state2 = jax.random.normal(k_state2, (batch2, num_inputs), jnp.float32)
    forward_tiled = make_policy_forward(params, tb=64)
    mean2 = jax.block_until_ready(forward_tiled(state2))
    ref2 = reference_forward(state2, params)
    assert mean2.shape == (batch2, num_actions)
    assert jnp.allclose(mean2, ref2, atol=1e-5, rtol=1e-5), "mismatch (tiled)"

    # 3) bf16 weight / f32 accumulation path (looser tolerance).
    forward_bf16 = make_policy_forward(params, use_bf16=True)
    mean3 = jax.block_until_ready(forward_bf16(state2))
    assert mean3.shape == (batch2, num_actions)
    assert jnp.allclose(mean3, ref2, atol=3e-2, rtol=3e-2), "mismatch (bf16)"

    print("KERNEL_OK")
</pallas_src>

<mosaic_0001>
module attributes {stable_mosaic.version = 11 : i64} {
  func.func @_policy_kernel(%arg0: i32, %arg1: memref<8x128xf32, #tpu.memory_space<vmem>>, %arg2: memref<128x128xf32, #tpu.memory_space<vmem>>, %arg3: memref<1x128xf32, #tpu.memory_space<vmem>>, %arg4: memref<128x128xf32, #tpu.memory_space<vmem>>, %arg5: memref<1x128xf32, #tpu.memory_space<vmem>>, %arg6: memref<128x128xf32, #tpu.memory_space<vmem>>, %arg7: memref<1x128xf32, #tpu.memory_space<vmem>>, %arg8: memref<8x128xf32, #tpu.memory_space<vmem>>) attributes {dimension_semantics = [#tpu.dimension_semantics<parallel>], iteration_bounds = array<i64: 1>, scalar_prefetch = 0 : i64, scratch_operands = 0 : i64, tpu.core_type = #tpu.core_type<tc>, window_params = [{transform_indices = @transform_0, window_bounds = array<i64: 8, 128>}, {pipeline_mode = #tpu.pipeline_mode<synchronous>, transform_indices = @transform_1, window_bounds = array<i64: 128, 128>}, {pipeline_mode = #tpu.pipeline_mode<synchronous>, transform_indices = @transform_2, window_bounds = array<i64: 1, 128>}, {pipeline_mode = #tpu.pipeline_mode<synchronous>, transform_indices = @transform_3, window_bounds = array<i64: 128, 128>}, {pipeline_mode = #tpu.pipeline_mode<synchronous>, transform_indices = @transform_4, window_bounds = array<i64: 1, 128>}, {pipeline_mode = #tpu.pipeline_mode<synchronous>, transform_indices = @transform_5, window_bounds = array<i64: 128, 128>}, {pipeline_mode = #tpu.pipeline_mode<synchronous>, transform_indices = @transform_6, window_bounds = array<i64: 1, 128>}, {transform_indices = @transform_7, window_bounds = array<i64: 8, 128>}]} {
    %c0 = arith.constant 0 : index
    %c0_0 = arith.constant 0 : index
    %0 = vector.load %arg1[%c0, %c0_0] : memref<8x128xf32, #tpu.memory_space<vmem>>, vector<8x128xf32>
    %c0_1 = arith.constant 0 : index
    %c0_2 = arith.constant 0 : index
    %1 = vector.load %arg2[%c0_1, %c0_2] : memref<128x128xf32, #tpu.memory_space<vmem>>, vector<128x128xf32>
    %cst = arith.constant dense<0.000000e+00> : vector<8x128xf32>
    %2 = tpu.matmul %0, %1, %cst {dimension_numbers = #tpu.dot_dimension_numbers<[1], [0], [0], [1], [0, 0, 1, 1], [], []>} : vector<8x128xf32>, vector<128x128xf32>, vector<8x128xf32> -> vector<8x128xf32>
    %c0_3 = arith.constant 0 : index
    %c0_4 = arith.constant 0 : index
    %3 = vector.load %arg3[%c0_3, %c0_4] : memref<1x128xf32, #tpu.memory_space<vmem>>, vector<1x128xf32>
    %4 = vector.broadcast %3 : vector<1x128xf32> to vector<8x128xf32>
    %5 = arith.addf %2, %4 : vector<8x128xf32>
    %cst_5 = arith.constant 0.000000e+00 : f32
    %6 = vector.broadcast %cst_5 : f32 to vector<8x128xf32>
    %7 = arith.maximumf %5, %6 : vector<8x128xf32>
    %c0_6 = arith.constant 0 : index
    %c0_7 = arith.constant 0 : index
    %8 = vector.load %arg4[%c0_6, %c0_7] : memref<128x128xf32, #tpu.memory_space<vmem>>, vector<128x128xf32>
    %cst_8 = arith.constant dense<0.000000e+00> : vector<8x128xf32>
    %9 = tpu.matmul %7, %8, %cst_8 {dimension_numbers = #tpu.dot_dimension_numbers<[1], [0], [0], [1], [0, 0, 1, 1], [], []>} : vector<8x128xf32>, vector<128x128xf32>, vector<8x128xf32> -> vector<8x128xf32>
    %c0_9 = arith.constant 0 : index
    %c0_10 = arith.constant 0 : index
    %10 = vector.load %arg5[%c0_9, %c0_10] : memref<1x128xf32, #tpu.memory_space<vmem>>, vector<1x128xf32>
    %11 = vector.broadcast %10 : vector<1x128xf32> to vector<8x128xf32>
    %12 = arith.addf %9, %11 : vector<8x128xf32>
    %cst_11 = arith.constant 0.000000e+00 : f32
    %13 = vector.broadcast %cst_11 : f32 to vector<8x128xf32>
    %14 = arith.maximumf %12, %13 : vector<8x128xf32>
    %c0_12 = arith.constant 0 : index
    %c0_13 = arith.constant 0 : index
    %15 = vector.load %arg6[%c0_12, %c0_13] : memref<128x128xf32, #tpu.memory_space<vmem>>, vector<128x128xf32>
    %cst_14 = arith.constant dense<0.000000e+00> : vector<8x128xf32>
    %16 = tpu.matmul %14, %15, %cst_14 {dimension_numbers = #tpu.dot_dimension_numbers<[1], [0], [0], [1], [0, 0, 1, 1], [], []>} : vector<8x128xf32>, vector<128x128xf32>, vector<8x128xf32> -> vector<8x128xf32>
    %c0_15 = arith.constant 0 : index
    %c0_16 = arith.constant 0 : index
    %17 = vector.load %arg7[%c0_15, %c0_16] : memref<1x128xf32, #tpu.memory_space<vmem>>, vector<1x128xf32>
    %18 = vector.broadcast %17 : vector<1x128xf32> to vector<8x128xf32>
    %19 = arith.addf %16, %18 : vector<8x128xf32>
    %20 = math.tanh %19 : vector<8x128xf32>
    %c0_17 = arith.constant 0 : index
    %c0_18 = arith.constant 0 : index
    %21 = vector.load %arg8[%c0_17, %c0_18] : memref<8x128xf32, #tpu.memory_space<vmem>>, vector<8x128xf32>
    tpu.vector_store %arg8[%c0_17, %c0_18], %20 {strides = array<i32>} : memref<8x128xf32, #tpu.memory_space<vmem>>, vector<8x128xf32>,
    return
  }
  func.func @transform_0(%arg0: i32) -> (i32, i32) {
    %c0_i32 = arith.constant 0 : i32
    %c0_i32_0 = arith.constant 0 : i32
    return %arg0, %c0_i32 : i32, i32
  }
  func.func @transform_1(%arg0: i32) -> (i32, i32) {
    %c0_i32 = arith.constant 0 : i32
    %c0_i32_0 = arith.constant 0 : i32
    %c0_i32_1 = arith.constant 0 : i32
    return %c0_i32, %c0_i32_0 : i32, i32
  }
  func.func @transform_2(%arg0: i32) -> (i32, i32) {
    %c0_i32 = arith.constant 0 : i32
    %c0_i32_0 = arith.constant 0 : i32
    %c0_i32_1 = arith.constant 0 : i32
    return %c0_i32, %c0_i32_0 : i32, i32
  }
  func.func @transform_3(%arg0: i32) -> (i32, i32) {
    %c0_i32 = arith.constant 0 : i32
    %c0_i32_0 = arith.constant 0 : i32
    %c0_i32_1 = arith.constant 0 : i32
    return %c0_i32, %c0_i32_0 : i32, i32
  }
  func.func @transform_4(%arg0: i32) -> (i32, i32) {
    %c0_i32 = arith.constant 0 : i32
    %c0_i32_0 = arith.constant 0 : i32
    %c0_i32_1 = arith.constant 0 : i32
    return %c0_i32, %c0_i32_0 : i32, i32
  }
  func.func @transform_5(%arg0: i32) -> (i32, i32) {
    %c0_i32 = arith.constant 0 : i32
    %c0_i32_0 = arith.constant 0 : i32
    %c0_i32_1 = arith.constant 0 : i32
    return %c0_i32, %c0_i32_0 : i32, i32
  }
  func.func @transform_6(%arg0: i32) -> (i32, i32) {
    %c0_i32 = arith.constant 0 : i32
    %c0_i32_0 = arith.constant 0 : i32
    %c0_i32_1 = arith.constant 0 : i32
    return %c0_i32, %c0_i32_0 : i32, i32
  }
  func.func @transform_7(%arg0: i32) -> (i32, i32) {
    %c0_i32 = arith.constant 0 : i32
    %c0_i32_0 = arith.constant 0 : i32
    return %arg0, %c0_i32 : i32, i32
  }
}

</mosaic_0001>

<bundles_post_ra>
// kernel: forward.1
= control target key start
LH: loop header
LB: loop body
LE: loop exit
PB: predicated region body
PF: predicated region fallthrough
CT: control target
= control target key end

     0   :  { %12 = vsyncpa [#allocation3], 0  ;;  %s813_s0 = inlined_call_operand.vmem [shape: f32[8,128], index: 0, kind: input, shape index: {}]   ;;  %s814_s1 = inlined_call_operand.hbm [shape: f32[128,128], index: 1, kind: input, shape index: {}]   ;;  %s815_s2 = inlined_call_operand.vmem [shape: f32[1,128], index: 2, kind: input, shape index: {}, may-alias: {2,4,6}]   ;;  %s816_s3 = inlined_call_operand.hbm [shape: f32[128,128], index: 3, kind: input, shape index: {}]   ;;  %s817_s4 = inlined_call_operand.vmem [shape: f32[1,128], index: 4, kind: input, shape index: {}, may-alias: {2,4,6}]   ;;  %s818_s5 = inlined_call_operand.hbm [shape: f32[128,128], index: 5, kind: input, shape index: {}]   ;;  %s819_s6 = inlined_call_operand.vmem [shape: f32[1,128], index: 6, kind: input, shape index: {}, may-alias: {2,4,6}]   ;;  %s820_s7 = inlined_call_operand.vmem [shape: f32[8,128], index: 7, kind: output, shape index: {}]  }
   0x1   :  { %13 = vsyncpa [#allocation5], 0  ;;  %s668_s24 = smov [#allocation4]   ;;  %s669_s26 = smov [#allocation2]  }
   0x2   :  { %s35_s25 = sshll.u32 %s668_s24, 4  ;;  %s21_s27 = sshll.u32 %s669_s26, 4  ;;  %s36_s25 = int_to_ptr.vmem [resolvable:$true] %s35_s25  ;;  %s716_s27 = int_to_ptr.vmem [resolvable:$true] %s21_s27 }
   0x3   :  { %s598_s30 = scalar_lea.hbm %s816_s3, 2048 }
   0x4   :  { %p599_p0 = scmp.ne.s32.totalorder %s816_s3, %s598_s30  ;;  %p602_p1 = scmp.lt.u32.totalorder %s598_s30, %s816_s3 }
   0x6   :  { %p604_p2 = pnand %p602_p1, %p599_p0 }
   0x8   :  { %607 = shalt.err (!%p604_p2)
}
   0x9   :  { %s608_s12 = scalar_lea.vmem %s36_s25, 2048  ;;  %p613_p4 = scmp.lt.s32.totalorder %s36_s25, %s36_s25 }
   0xa   :  { %p609_p3 = scmp.ne.s32.totalorder %s36_s25, %s608_s12  ;;  %p614_p5 = scmp.lt.s32.totalorder %s608_s12, %s608_s12 }
   0xc   :  { %p615_p6 = por %p614_p5, %p613_p4 }
   0xe   :  { %p616_p7 = pnand %p615_p6, %p609_p3 }
  0x10   :  { %619 = shalt.err (!%p616_p7)
}
  0x11   :  { %s670_s13 = smov 128   ;;  %s671_s14 = smov 8  }
  0x12   :  { %41 = dma.hbm_to_vmem [thread:$0]  %s816_s3, 2048, %s36_s25, [#allocation5], %s670_s13, %s670_s13, %s671_s14  }
  0x13   :  { %s620_s19 = scalar_lea.hbm %s814_s1, 2048 }
  0x14   :  { %p621_p8 = scmp.ne.s32.totalorder %s814_s1, %s620_s19  ;;  %p624_p9 = scmp.lt.u32.totalorder %s620_s19, %s814_s1 }
  0x16   :  { %p626_p10 = pnand %p624_p9, %p621_p8 }
  0x18   :  { %629 = shalt.err (!%p626_p10)
}
  0x19   :  { %s630_s24 = scalar_lea.vmem %s716_s27, 2048  ;;  %p635_p12 = scmp.lt.s32.totalorder %s716_s27, %s716_s27 }
  0x1a   :  { %p631_p11 = scmp.ne.s32.totalorder %s716_s27, %s630_s24  ;;  %p636_p13 = scmp.lt.s32.totalorder %s630_s24, %s630_s24 }
  0x1c   :  { %p637_p0 = por %p636_p13, %p635_p12 }
  0x1e   :  { %p638_p1 = pnand %p637_p0, %p631_p11 }
  0x20   :  { %641 = shalt.err (!%p638_p1)
}
  0x21   :  { %27 = dma.hbm_to_vmem [thread:$0]  %s814_s1, 2048, %s716_s27, [#allocation3], %s670_s13, %s670_s13, %s671_s14  }
  0x22   :  { %s672_s26 = smov [#allocation6]   ;;  %s642_s8 = scalar_lea.hbm %s818_s5, 2048 }
  0x23   :  { %s49_s28 = sshll.u32 %s672_s26, 4  ;;  %p643_p2 = scmp.ne.s32.totalorder %s818_s5, %s642_s8  ;;  %s50_s28 = int_to_ptr.vmem [resolvable:$true] %s49_s28 }
  0x24   :  { %p646_p3 = scmp.lt.u32.totalorder %s642_s8, %s818_s5 }
  0x26   :  { %p648_p4 = pnand %p646_p3, %p643_p2 }
  0x28   :  { %651 = shalt.err (!%p648_p4)
}
  0x29   :  { %s652_s15 = scalar_lea.vmem %s50_s28, 2048  ;;  %p657_p6 = scmp.lt.s32.totalorder %s50_s28, %s50_s28 }
  0x2a   :  { %p653_p5 = scmp.ne.s32.totalorder %s50_s28, %s652_s15  ;;  %p658_p7 = scmp.lt.s32.totalorder %s652_s15, %s652_s15 }
  0x2c   :  { %p659_p8 = por %p658_p7, %p657_p6 }
  0x2e   :  { %p660_p9 = pnand %p659_p8, %p653_p5 }
  0x30   :  { %663 = shalt.err (!%p660_p9)
}
  0x31   :  { %55 = dma.hbm_to_vmem [thread:$0]  %s818_s5, 2048, %s50_s28, [#allocation5], %s670_s13, %s670_s13, %s671_s14  }
  0x32   :  { %664 = dma.done.wait [#allocation3], 2048  }
  0x33   :  { %665 = vsyncadd [#allocation3], 4294965248 }
  0x34   :  { %666 = dma.done.wait [#allocation5], 4096  }
  0x35   :  { %667 = vsyncadd [#allocation5], 4294963200  ;;  %v673_v0 = vmov 0.0|0.0   ;;  %vm674_vm0 = vmmov 0   ;;  %v675_v1 = vmov 0.0   ;;  %v68_v2 = vld [vmem:[#allocation2] sm:$0xff] }
  0x36   :  { %516 = vmatprep.subr.bf16.mxu0 %v673_v0  ;;  %443 = vmatprep.mubr.msk.f32.mxu0 %vm674_vm0, %v675_v1  ;;  %v69_v3 = vld [vmem:[#allocation2 + $0x8] sm:$0xff]  ;;  %v70_v4 = vld [vmem:[#allocation2 + $0x10] sm:$0xff]  ;;  %v71_v6 = vld [vmem:[#allocation2 + $0x18] sm:$0xff] }
  0x37   :  { %540 = vmatprep.subr.bf16.mxu1 %v673_v0  ;;  %478 = vmatprep.mubr.msk.f32.mxu1 %vm674_vm0, %v675_v1  ;;  %v517_v5 = vpack.c.bf16 %v69_v3, %v68_v2  ;;  %v520_v7 = vpack.c.bf16 %v71_v6, %v70_v4  ;;  %v72_v8 = vld [vmem:[#allocation2 + $0x20] sm:$0xff]  ;;  %v73_v9 = vld [vmem:[#allocation2 + $0x28] sm:$0xff]  ;;  %v164_v12 = vld [vmem:[#allocation4 + $0x10] sm:$0xff] }
  0x38   :  { %v162_v10 = vld [vmem:[#allocation4] sm:$0xff]  ;;  %v163_v11 = vld [vmem:[#allocation4 + $0x8] sm:$0xff]  ;;  %v165_v13 = vld [vmem:[#allocation4 + $0x18] sm:$0xff]  ;;  %v523_v14 = vpack.c.bf16 %v73_v9, %v72_v8 }
  0x39   :  { %518 = vmatpush3.bf16.msra.mxu0 %v517_v5  ;;  %v541_v15 = vpack.c.bf16 %v163_v11, %v162_v10  ;;  %v74_v16 = vld [vmem:[#allocation2 + $0x30] sm:$0xff]  ;;  %v75_v17 = vld [vmem:[#allocation2 + $0x38] sm:$0xff]  ;;  %v544_v18 = vpack.c.bf16 %v165_v13, %v164_v12  ;;  %v166_v19 = vld [vmem:[#allocation4 + $0x20] sm:$0xff] }
  0x3a   :  { %519 = vmatprep.subr.bf16.mxu0 %v673_v0  ;;  %v167_v20 = vld [vmem:[#allocation4 + $0x28] sm:$0xff]  ;;  %v526_v21 = vpack.c.bf16 %v75_v17, %v74_v16  ;;  %v76_v22 = vld [vmem:[#allocation2 + $0x40] sm:$0xff]  ;;  %v168_v25 = vld [vmem:[#allocation4 + $0x30] sm:$0xff] }
  0x3b   :  { %542 = vmatpush3.bf16.msra.mxu1 %v541_v15  ;;  %v77_v23 = vld [vmem:[#allocation2 + $0x48] sm:$0xff]  ;;  %v547_v24 = vpack.c.bf16 %v167_v20, %v166_v19  ;;  %v169_v26 = vld [vmem:[#allocation4 + $0x38] sm:$0xff]  ;;  %v78_v28 = vld [vmem:[#allocation2 + $0x50] sm:$0xff] }
  0x3c   :  { %543 = vmatprep.subr.bf16.mxu1 %v673_v0  ;;  %v529_v27 = vpack.c.bf16 %v77_v23, %v76_v22  ;;  %v79_v29 = vld [vmem:[#allocation2 + $0x58] sm:$0xff]  ;;  %v550_v30 = vpack.c.bf16 %v169_v26, %v168_v25  ;;  %v170_v31 = vld [vmem:[#allocation4 + $0x40] sm:$0xff]  ;;  %v171_v32 = vld [vmem:[#allocation4 + $0x48] sm:$0xff] }
  0x3d   :  { %521 = vmatpush3.bf16.msra.mxu0 %v520_v7  ;;  %v532_v33 = vpack.c.bf16 %v79_v29, %v78_v28  ;;  %v80_v34 = vld [vmem:[#allocation2 + $0x60] sm:$0xff]  ;;  %v81_v35 = vld [vmem:[#allocation2 + $0x68] sm:$0xff]  ;;  %v553_v36 = vpack.c.bf16 %v171_v32, %v170_v31  ;;  %v172_v37 = vld [vmem:[#allocation4 + $0x50] sm:$0xff] }
  0x3e   :  { %522 = vmatprep.subr.bf16.mxu0 %v673_v0  ;;  %v173_v38 = vld [vmem:[#allocation4 + $0x58] sm:$0xff]  ;;  %v535_v39 = vpack.c.bf16 %v81_v35, %v80_v34  ;;  %v82_v40 = vld [vmem:[#allocation2 + $0x70] sm:$0xff]  ;;  %v174_v43 = vld [vmem:[#allocation4 + $0x60] sm:$0xff] }
  0x3f   :  { %545 = vmatpush3.bf16.msra.mxu1 %v544_v18  ;;  %v83_v41 = vld [vmem:[#allocation2 + $0x78] sm:$0xff]  ;;  %v556_v42 = vpack.c.bf16 %v173_v38, %v172_v37  ;;  %v175_v44 = vld [vmem:[#allocation4 + $0x68] sm:$0xff]  ;;  %v176_v48 = vld [vmem:[#allocation4 + $0x70] sm:$0xff] }
  0x40   :  { %546 = vmatprep.subr.bf16.mxu1 %v673_v0  ;;  %v538_v45 = vpack.c.bf16 %v83_v41, %v82_v40  ;;  %v559_v46 = vpack.c.bf16 %v175_v44, %v174_v43  ;;  %v67_v47 = vld [vmem:[%s813_s0] sm:$0xff]  ;;  %v256_v51 = vld [vmem:[#allocation6] sm:$0xff]  ;;  %v257_v52 = vld [vmem:[#allocation6 + $0x8] sm:$0xff] }
  0x41   :  { %524 = vmatpush3.bf16.msra.mxu0 %v523_v14  ;;  %v177_v49 = vld [vmem:[#allocation4 + $0x78] sm:$0xff]  ;;  %v258_v53 = vld [vmem:[#allocation6 + $0x10] sm:$0xff]  ;;  %v565_v54 = vpack.c.bf16 %v257_v52, %v256_v51  ;;  %v260_v57 = vld [vmem:[#allocation6 + $0x20] sm:$0xff] }
  0x42   :  { %525 = vmatprep.subr.bf16.mxu0 %v673_v0  ;;  %v562_v50 = vpack.c.bf16 %v177_v49, %v176_v48  ;;  %v259_v55 = vld [vmem:[#allocation6 + $0x18] sm:$0xff]  ;;  %v261_v58 = vld [vmem:[#allocation6 + $0x28] sm:$0xff]  ;;  %v262_v60 = vld [vmem:[#allocation6 + $0x30] sm:$0xff] }
  0x43   :  { %548 = vmatpush3.bf16.msra.mxu1 %v547_v24  ;;  %v568_v56 = vpack.c.bf16 %v259_v55, %v258_v53  ;;  %v571_v59 = vpack.c.bf16 %v261_v58, %v260_v57  ;;  %v263_v61 = vld [vmem:[#allocation6 + $0x38] sm:$0xff]  ;;  %v264_v63 = vld [vmem:[#allocation6 + $0x40] sm:$0xff]  ;;  %v266_v3 = vld [vmem:[#allocation6 + $0x50] sm:$0xff] }
  0x44   :  { %549 = vmatprep.subr.bf16.mxu1 %v673_v0  ;;  %v574_v62 = vpack.c.bf16 %v263_v61, %v262_v60  ;;  %v267_v4 = vld [vmem:[#allocation6 + $0x58] sm:$0xff]  ;;  %v268_v6 = vld [vmem:[#allocation6 + $0x60] sm:$0xff]  ;;  %v269_v7 = vld [vmem:[#allocation6 + $0x68] sm:$0xff] }
  0x45   :  { %527 = vmatpush3.bf16.msra.mxu0 %v526_v21  ;;  %v580_v5 = vpack.c.bf16 %v267_v4, %v266_v3  ;;  %v583_v8 = vpack.c.bf16 %v269_v7, %v268_v6  ;;  %v357_v9 = vld [vmem:[%s815_s2] ss:$0 sm:$0xff]  ;;  %v270_v14 = vld [vmem:[#allocation6 + $0x70] sm:$0xff] }
  0x46   :  { %528 = vmatprep.subr.bf16.mxu0 %v673_v0  ;;  %v271_v15 = vld [vmem:[#allocation6 + $0x78] sm:$0xff] }
  0x47   :  { %551 = vmatpush3.bf16.msra.mxu1 %v550_v30  ;;  %v586_v16 = vpack.c.bf16 %v271_v15, %v270_v14  ;;  %v358_v17 = vld [vmem:[%s817_s4] ss:$0 sm:$0xff] }
  0x48   :  { %552 = vmatprep.subr.bf16.mxu1 %v673_v0  ;;  %v359_v21 = vld [vmem:[%s819_s6] ss:$0 sm:$0xff] }
  0x49   :  { %530 = vmatpush3.bf16.msra.mxu0 %v529_v27 }
  0x4a   :  { %531 = vmatprep.subr.bf16.mxu0 %v673_v0 }
  0x4b   :  { %554 = vmatpush3.bf16.msra.mxu1 %v553_v36 }
  0x4c   :  { %555 = vmatprep.subr.bf16.mxu1 %v673_v0 }
  0x4d   :  { %533 = vmatpush3.bf16.msra.mxu0 %v532_v33 }
  0x4e   :  { %534 = vmatprep.subr.bf16.mxu0 %v673_v0 }
  0x4f   :  { %557 = vmatpush3.bf16.msra.mxu1 %v556_v42 }
  0x50   :  { %558 = vmatprep.subr.bf16.mxu1 %v673_v0 }
  0x51   :  { %536 = vmatpush3.bf16.msra.mxu0 %v535_v39 }
  0x52   :  { %537 = vmatprep.subr.bf16.mxu0 %v673_v0 }
  0x53   :  { %560 = vmatpush3.bf16.msra.mxu1 %v559_v46 }
  0x54   :  { %561 = vmatprep.subr.bf16.mxu1 %v673_v0 }
  0x55   :  { %539 = vmatpush3.bf16.msra.mxu0 %v538_v45 }
  0x56   :  { %564 = vmatprep.subr.bf16.mxu0 %v673_v0 }
  0x57   :  { %563 = vmatpush3.bf16.msra.mxu1 %v562_v50 }
  0x58   :  { %444 = vmatmul.mubr.f32.vlgmr.msra.gmra.mrb[0].mxu0 %v67_v47 }
  0x59   :  { %513 = vmatprep.mubr.msk.f32.mxu0 %vm674_vm0, %v675_v1  ;;  %566 = vmatpush3.bf16.msra.mxu0 %v565_v54  ;;  %v265_v1 = vld [vmem:[#allocation6 + $0x48] sm:$0xff] }
  0x5a   :  { %567 = vmatprep.subr.bf16.mxu0 %v673_v0  ;;  %v577_v2 = vpack.c.bf16 %v265_v1, %v264_v63 }
  0x5d   :  { %569 = vmatpush3.bf16.msra.mxu0 %v568_v56 }
  0x5e   :  { %570 = vmatprep.subr.bf16.mxu0 %v673_v0 }
  0x61   :  { %572 = vmatpush3.bf16.msra.mxu0 %v571_v59 }
  0x62   :  { %573 = vmatprep.subr.bf16.mxu0 %v673_v0 }
  0x65   :  { %575 = vmatpush3.bf16.msra.mxu0 %v574_v62 }
  0x66   :  { %576 = vmatprep.subr.bf16.mxu0 %v673_v0 }
  0x69   :  { %578 = vmatpush3.bf16.msra.mxu0 %v577_v2 }
  0x6a   :  { %579 = vmatprep.subr.bf16.mxu0 %v673_v0 }
  0x6d   :  { %581 = vmatpush3.bf16.msra.mxu0 %v580_v5 }
  0x6e   :  { %582 = vmatprep.subr.bf16.mxu0 %v673_v0 }
  0x71   :  { %584 = vmatpush3.bf16.msra.mxu0 %v583_v8 }
  0x72   :  { %585 = vmatprep.subr.bf16.mxu0 %v673_v0 }
  0x75   :  { %587 = vmatpush3.bf16.msra.mxu0 %v586_v16 }
 0x12b   :  { %v157_v10 = vpop.f32.mrb[0].mxu0 }
 0x12c   :  { %v158_v11 = vadd.f32 %v357_v9, %v157_v10  ;;  %v445_v12 = vpop.f32.mrb[1].mxu0 }
 0x12e   :  { %v161_v13 = vmax.f32 %v158_v11, 0.0 }
 0x130   :  { %479 = vmatmul.mubr.f32.vlgmr.msra.gmra.mrb[0].mxu1 %v161_v13 }
 0x203   :  { %v251_v18 = vpop.f32.mrb[0].mxu1 }
 0x204   :  { %v252_v19 = vadd.f32 %v358_v17, %v251_v18  ;;  %v480_v0 = vpop.f32.mrb[1].mxu1 }
 0x206   :  { %v255_v20 = vmax.f32 %v252_v19, 0.0 }
 0x208   :  { %514 = vmatmul.mubr.f32.vlgmr.msra.gmra.mrb[2].mxu0 %v255_v20 }
 0x2db   :  { %v345_v22 = vpop.f32.mrb[2].mxu0 }
 0x2dc   :  { %v346_v23 = vadd.f32 %v359_v21, %v345_v22  ;;  %v515_v24 = vpop.f32.mrb[3].mxu0 }
 0x2de   :  { %596 = vtanh.f32 %v346_v23 }
 0x2e8   :  { %v597_v25 = vpop.eup %596 }
 0x2e9   :  { %350 = vst [vmem:[%s820_s7] sm:$0xff] %v597_v25 }
 0x2ea   :  { %355 = vsyncpa [#allocation3], 1 }
 0x2eb   :  { %356 = vsyncpa [#allocation5], 1 }

</bundles_post_ra>
